<compile_context>
chip_gen: v7x
topology: tpu7x:2x2x1
jax: 0.10.0
libtpu: 0.0.40
codegen_flags: <defaults>
</compile_context>

<pallas_src>
import jax
import jax.numpy as jnp
from jax.experimental import pallas as pl
from jax.experimental.pallas import tpu as pltpu

CL = 512            # adapter input/output width
MC = CL // 64       # true bottleneck width = 8
MCP = 128           # lane-padded bottleneck width


def _round_up(x, m):
    return ((x + m - 1) // m) * m


def bdater_kernel(x_ref, wd_ref, bd_ref, wm_ref, bm_ref, wu_ref, bu_ref, o_ref):
    # MXU operands in bf16, accumulation + bias/ReLU in f32.
    xb = x_ref[...].astype(jnp.bfloat16)                               # (tm, 512)

    # down-projection + ReLU (bottleneck padded to 128 lanes; pad lanes stay 0)
    h = jnp.dot(xb, wd_ref[...], preferred_element_type=jnp.float32) + bd_ref[...]
    h = jnp.maximum(h, 0.0)                                            # (tm, 128) f32

    # middle projection with residual folded in: wm_ref = I + Wm^T (padded).
    # TODO(synk): nn.Dropout(0.1) is identity in eval mode; training-mode
    # stochastic masking (pltpu.prng_*) is intentionally omitted.
    g = jnp.dot(h.astype(jnp.bfloat16), wm_ref[...],
                preferred_element_type=jnp.float32) + bm_ref[...]
    g = jnp.maximum(g, 0.0)                                            # (tm, 128) f32

    # up-projection (scalar scale s and bias bu pre-folded into wu_ref/bu_ref)
    y = jnp.dot(g.astype(jnp.bfloat16), wu_ref[...],
                preferred_element_type=jnp.float32) + bu_ref[...]
    o_ref[...] = y.astype(o_ref.dtype)                                 # (tm, 512)


def prepare_bdater_params(params, mxu_dtype=jnp.bfloat16):
    """One-time weight prep: pad bottleneck to 128 lanes, fold residual + scale,
    transpose to (in, out) layout, cast matmul operands to bf16."""
    s = params["s"].astype(jnp.float32)[0]

    wd_t = jnp.zeros((CL, MCP), jnp.float32).at[:, :MC].set(params["wd"].T)
    bd = jnp.zeros((1, MCP), jnp.float32).at[:, :MC].set(params["bd"])
    # residual fold: h + h @ Wm^T == h @ (I + Wm^T); padded lanes of h are 0 so
    # the full-size identity is exact.
    wm_fold = jnp.eye(MCP, dtype=jnp.float32).at[:MC, :MC].add(params["wm"].T)
    bm = jnp.zeros((1, MCP), jnp.float32).at[:, :MC].set(params["bm"])
    wu_t = jnp.zeros((MCP, CL), jnp.float32).at[:MC, :].set(params["wu"].T * s)
    bu = (params["bu"] * s).reshape(1, CL)

    return {
        "wd": wd_t.astype(mxu_dtype), "bd": bd,
        "wm": wm_fold.astype(mxu_dtype), "bm": bm,
        "wu": wu_t.astype(mxu_dtype), "bu": bu,
    }


def bdater_forward(x, prepped, *, tm=2048):
    """x: (B, N, CL) float32; prepped: output of prepare_bdater_params."""
    B, N, C = x.shape
    assert C == CL
    M = B * N
    x2 = x.reshape(M, CL)

    # Big tile for bandwidth, but ensure >=2 grid steps when possible so v7x
    # megacore engages both TensorCores; always a multiple of 8 sublanes.
    tm_eff = max(8, min(tm, _round_up(pl.cdiv(M, 2), 8)))
    grid = (pl.cdiv(M, tm_eff),)   # ragged last block handled by Pallas (no pad copy)

    flops = 2 * M * (CL * MCP + MCP * MCP + MCP * CL)
    bytes_accessed = (2 * M * CL * 4                                  # x in + y out (f32)
                      + (CL * MCP + MCP * MCP + MCP * CL) * 2         # bf16 weights
                      + (2 * MCP + CL) * 4)                           # biases

    out = pl.pallas_call(
        bdater_kernel,
        out_shape=jax.ShapeDtypeStruct((M, CL), x.dtype),
        grid_spec=pltpu.PrefetchScalarGridSpec(
            num_scalar_prefetch=0,
            grid=grid,
            in_specs=[
                pl.BlockSpec((tm_eff, CL), lambda i: (i, 0)),   # x rows
                pl.BlockSpec((CL, MCP), lambda i: (0, 0)),      # Wd^T (padded, bf16)
                pl.BlockSpec((1, MCP), lambda i: (0, 0)),       # bd
                pl.BlockSpec((MCP, MCP), lambda i: (0, 0)),     # I + Wm^T (padded, bf16)
                pl.BlockSpec((1, MCP), lambda i: (0, 0)),       # bm
                pl.BlockSpec((MCP, CL), lambda i: (0, 0)),      # Wu^T * s (padded, bf16)
                pl.BlockSpec((1, CL), lambda i: (0, 0)),        # bu * s
            ],
            out_specs=pl.BlockSpec((tm_eff, CL), lambda i: (i, 0)),
        ),
        compiler_params=pltpu.CompilerParams(
            dimension_semantics=("parallel",),      # megacore sharding on v7x
            vmem_limit_bytes=56 * 1024 * 1024,      # 2048-row f32 tiles, double-buffered
        ),
        cost_estimate=pl.CostEstimate(
            flops=flops, transcendentals=0, bytes_accessed=bytes_accessed),
    )(x2, prepped["wd"], prepped["bd"], prepped["wm"], prepped["bm"],
      prepped["wu"], prepped["bu"])

    return out.reshape(B, N, CL)


def init_params(key):
    # The PyTorch module zero-inits all adapter weights (trivial output);
    # here we use small deterministic random values so the kernel compute is
    # actually exercised. Shapes follow nn.Linear (out_features, in_features).
    k = jax.random.split(key, 6)
    scale = 0.02
    return {
        "wd": scale * jax.random.normal(k[0], (MC, CL), jnp.float32),
        "bd": scale * jax.random.normal(k[1], (MC,), jnp.float32),
        "wm": scale * jax.random.normal(k[2], (MC, MC), jnp.float32),
        "bm": scale * jax.random.normal(k[3], (MC,), jnp.float32),
        "wu": scale * jax.random.normal(k[4], (CL, MC), jnp.float32),
        "bu": scale * jax.random.normal(k[5], (CL,), jnp.float32),
        "s": jnp.array([1.5], jnp.float32),   # non-unit so the folded scale is exercised
    }


def bdater_ref(x, p):
    # Pure-JAX f32 reference of the PyTorch forward (eval mode).
    h = jnp.maximum(x @ p["wd"].T + p["bd"], 0.0)
    m = h @ p["wm"].T + p["bm"]
    g = jnp.maximum(h + m, 0.0)
    y = g @ p["wu"].T + p["bu"]
    return y * p["s"]


if __name__ == "__main__":
    key = jax.random.PRNGKey(0)
    kx, kp = jax.random.split(key)

    B, N = 2, 8                      # small batch / sequence; feature dim fixed at 512
    x = jax.random.normal(kx, (B, N, CL), jnp.float32)
    params = init_params(kp)

    prepped = prepare_bdater_params(params)   # one-time weight prep (hoisted)
    out = bdater_forward(x, prepped)
    out = jax.block_until_ready(out)

    ref = bdater_ref(x, params)
    assert out.shape == (B, N, CL)
    # bf16 MXU operands (f32 accumulate) => relaxed tolerance vs the f32 reference.
    assert jnp.allclose(out, ref, atol=3e-3, rtol=3e-2), "mismatch vs JAX reference"
    assert not jnp.any(jnp.isnan(out)), "NaN in kernel output"

    print("KERNEL_OK")
</pallas_src>

<mosaic_0001>
module attributes {stable_mosaic.version = 11 : i64} {
  func.func @bdater_kernel(%arg0: i32, %arg1: memref<8x512xf32, #tpu.memory_space<vmem>>, %arg2: memref<512x128xbf16, #tpu.memory_space<vmem>>, %arg3: memref<1x128xf32, #tpu.memory_space<vmem>>, %arg4: memref<128x128xbf16, #tpu.memory_space<vmem>>, %arg5: memref<1x128xf32, #tpu.memory_space<vmem>>, %arg6: memref<128x512xbf16, #tpu.memory_space<vmem>>, %arg7: memref<1x512xf32, #tpu.memory_space<vmem>>, %arg8: memref<8x512xf32, #tpu.memory_space<vmem>>) attributes {dimension_semantics = [#tpu.dimension_semantics<parallel>], iteration_bounds = array<i64: 2>, scalar_prefetch = 0 : i64, scratch_operands = 0 : i64, tpu.core_type = #tpu.core_type<tc>, window_params = [{transform_indices = @transform_0, window_bounds = array<i64: 8, 512>}, {pipeline_mode = #tpu.pipeline_mode<synchronous>, transform_indices = @transform_1, window_bounds = array<i64: 512, 128>}, {pipeline_mode = #tpu.pipeline_mode<synchronous>, transform_indices = @transform_2, window_bounds = array<i64: 1, 128>}, {pipeline_mode = #tpu.pipeline_mode<synchronous>, transform_indices = @transform_3, window_bounds = array<i64: 128, 128>}, {pipeline_mode = #tpu.pipeline_mode<synchronous>, transform_indices = @transform_4, window_bounds = array<i64: 1, 128>}, {pipeline_mode = #tpu.pipeline_mode<synchronous>, transform_indices = @transform_5, window_bounds = array<i64: 128, 512>}, {pipeline_mode = #tpu.pipeline_mode<synchronous>, transform_indices = @transform_6, window_bounds = array<i64: 1, 512>}, {transform_indices = @transform_7, window_bounds = array<i64: 8, 512>}]} {
    %c0 = arith.constant 0 : index
    %c0_0 = arith.constant 0 : index
    %0 = vector.load %arg1[%c0, %c0_0] : memref<8x512xf32, #tpu.memory_space<vmem>>, vector<8x512xf32>
    %1 = arith.truncf %0 : vector<8x512xf32> to vector<8x512xbf16>
    %c0_1 = arith.constant 0 : index
    %c0_2 = arith.constant 0 : index
    %2 = vector.load %arg2[%c0_1, %c0_2] : memref<512x128xbf16, #tpu.memory_space<vmem>>, vector<512x128xbf16>
    %cst = arith.constant dense<0.000000e+00> : vector<8x128xf32>
    %3 = tpu.matmul %1, %2, %cst {dimension_numbers = #tpu.dot_dimension_numbers<[1], [0], [0], [1], [0, 0, 1, 1], [], []>} : vector<8x512xbf16>, vector<512x128xbf16>, vector<8x128xf32> -> vector<8x128xf32>
    %c0_3 = arith.constant 0 : index
    %c0_4 = arith.constant 0 : index
    %4 = vector.load %arg3[%c0_3, %c0_4] : memref<1x128xf32, #tpu.memory_space<vmem>>, vector<1x128xf32>
    %5 = vector.broadcast %4 : vector<1x128xf32> to vector<8x128xf32>
    %6 = arith.addf %3, %5 : vector<8x128xf32>
    %cst_5 = arith.constant 0.000000e+00 : f32
    %7 = vector.broadcast %cst_5 : f32 to vector<8x128xf32>
    %8 = arith.maximumf %6, %7 : vector<8x128xf32>
    %9 = arith.truncf %8 : vector<8x128xf32> to vector<8x128xbf16>
    %c0_6 = arith.constant 0 : index
    %c0_7 = arith.constant 0 : index
    %10 = vector.load %arg4[%c0_6, %c0_7] : memref<128x128xbf16, #tpu.memory_space<vmem>>, vector<128x128xbf16>
    %cst_8 = arith.constant dense<0.000000e+00> : vector<8x128xf32>
    %11 = tpu.matmul %9, %10, %cst_8 {dimension_numbers = #tpu.dot_dimension_numbers<[1], [0], [0], [1], [0, 0, 1, 1], [], []>} : vector<8x128xbf16>, vector<128x128xbf16>, vector<8x128xf32> -> vector<8x128xf32>
    %c0_9 = arith.constant 0 : index
    %c0_10 = arith.constant 0 : index
    %12 = vector.load %arg5[%c0_9, %c0_10] : memref<1x128xf32, #tpu.memory_space<vmem>>, vector<1x128xf32>
    %13 = vector.broadcast %12 : vector<1x128xf32> to vector<8x128xf32>
    %14 = arith.addf %11, %13 : vector<8x128xf32>
    %cst_11 = arith.constant 0.000000e+00 : f32
    %15 = vector.broadcast %cst_11 : f32 to vector<8x128xf32>
    %16 = arith.maximumf %14, %15 : vector<8x128xf32>
    %17 = arith.truncf %16 : vector<8x128xf32> to vector<8x128xbf16>
    %c0_12 = arith.constant 0 : index
    %c0_13 = arith.constant 0 : index
    %18 = vector.load %arg6[%c0_12, %c0_13] : memref<128x512xbf16, #tpu.memory_space<vmem>>, vector<128x512xbf16>
    %cst_14 = arith.constant dense<0.000000e+00> : vector<8x512xf32>
    %19 = tpu.matmul %17, %18, %cst_14 {dimension_numbers = #tpu.dot_dimension_numbers<[1], [0], [0], [1], [0, 0, 1, 1], [], []>} : vector<8x128xbf16>, vector<128x512xbf16>, vector<8x512xf32> -> vector<8x512xf32>
    %c0_15 = arith.constant 0 : index
    %c0_16 = arith.constant 0 : index
    %20 = vector.load %arg7[%c0_15, %c0_16] : memref<1x512xf32, #tpu.memory_space<vmem>>, vector<1x512xf32>
    %21 = vector.broadcast %20 : vector<1x512xf32> to vector<8x512xf32>
    %22 = arith.addf %19, %21 : vector<8x512xf32>
    %c0_17 = arith.constant 0 : index
    %c0_18 = arith.constant 0 : index
    %23 = vector.load %arg8[%c0_17, %c0_18] : memref<8x512xf32, #tpu.memory_space<vmem>>, vector<8x512xf32>
    tpu.vector_store %arg8[%c0_17, %c0_18], %22 {strides = array<i32>} : memref<8x512xf32, #tpu.memory_space<vmem>>, vector<8x512xf32>,
    return
  }
  func.func @transform_0(%arg0: i32) -> (i32, i32) {
    %c0_i32 = arith.constant 0 : i32
    %c0_i32_0 = arith.constant 0 : i32
    return %arg0, %c0_i32 : i32, i32
  }
  func.func @transform_1(%arg0: i32) -> (i32, i32) {
    %c0_i32 = arith.constant 0 : i32
    %c0_i32_0 = arith.constant 0 : i32
    %c0_i32_1 = arith.constant 0 : i32
    return %c0_i32, %c0_i32_0 : i32, i32
  }
  func.func @transform_2(%arg0: i32) -> (i32, i32) {
    %c0_i32 = arith.constant 0 : i32
    %c0_i32_0 = arith.constant 0 : i32
    %c0_i32_1 = arith.constant 0 : i32
    return %c0_i32, %c0_i32_0 : i32, i32
  }
  func.func @transform_3(%arg0: i32) -> (i32, i32) {
    %c0_i32 = arith.constant 0 : i32
    %c0_i32_0 = arith.constant 0 : i32
    %c0_i32_1 = arith.constant 0 : i32
    return %c0_i32, %c0_i32_0 : i32, i32
  }
  func.func @transform_4(%arg0: i32) -> (i32, i32) {
    %c0_i32 = arith.constant 0 : i32
    %c0_i32_0 = arith.constant 0 : i32
    %c0_i32_1 = arith.constant 0 : i32
    return %c0_i32, %c0_i32_0 : i32, i32
  }
  func.func @transform_5(%arg0: i32) -> (i32, i32) {
    %c0_i32 = arith.constant 0 : i32
    %c0_i32_0 = arith.constant 0 : i32
    %c0_i32_1 = arith.constant 0 : i32
    return %c0_i32, %c0_i32_0 : i32, i32
  }
  func.func @transform_6(%arg0: i32) -> (i32, i32) {
    %c0_i32 = arith.constant 0 : i32
    %c0_i32_0 = arith.constant 0 : i32
    %c0_i32_1 = arith.constant 0 : i32
    return %c0_i32, %c0_i32_0 : i32, i32
  }
  func.func @transform_7(%arg0: i32) -> (i32, i32) {
    %c0_i32 = arith.constant 0 : i32
    %c0_i32_0 = arith.constant 0 : i32
    return %arg0, %c0_i32 : i32, i32
  }
}

</mosaic_0001>

<bundles_post_ra>
// kernel: tpu_custom_call.1
= control target key start
LH: loop header
LB: loop body
LE: loop exit
PB: predicated region body
PF: predicated region fallthrough
CT: control target
= control target key end

     0   :  { %12 = vsyncpa [#allocation3], 0  ;;  %s2076_s0 = inlined_call_operand.hbm [shape: f32[16,512], index: 0, kind: input, shape index: {}]   ;;  %s2077_s1 = inlined_call_operand.hbm [shape: bf16[512,128], index: 1, kind: input, shape index: {}]   ;;  %s2078_s2 = inlined_call_operand.vmem [shape: f32[1,128], index: 2, kind: input, shape index: {}]   ;;  %s2079_s3 = inlined_call_operand.hbm [shape: bf16[128,128], index: 3, kind: input, shape index: {}]   ;;  %s2080_s4 = inlined_call_operand.vmem [shape: f32[1,128], index: 4, kind: input, shape index: {}]   ;;  %s2081_s5 = inlined_call_operand.hbm [shape: bf16[128,512], index: 5, kind: input, shape index: {}]   ;;  %s2082_s6 = inlined_call_operand.vmem [shape: f32[1,512], index: 6, kind: input, shape index: {}]   ;;  %s2083_s7 = inlined_call_operand.hbm [shape: f32[16,512], index: 7, kind: output, shape index: {}]  }
   0x1   :  { %14 = vsyncpa [#allocation3 + $0x1], 0 }
   0x2   :  { %15 = vsyncpa [#allocation6], 0 }
   0x3   :  { %16 = vsyncpa [#allocation9], 0 }
   0x4   :  { %17 = vsyncpa [#allocation4], 0 }
   0x5   :  { %19 = vsyncpa [#allocation4 + $0x1], 0  ;;  %s1803_s24 = smov 0   ;;  %s1805_s25 = smov 0  }
   0x6   :  { %s1807_s26 = smov 0   ;;  %s1809_s27 = smov 0  }
   0x7 LB: > { %s1824_s28 = sadd.s32 4294967295, %s1749_s27   ;;  %s1220_s29 = sadd.s32 4294967294, %s1749_s27   ;;  %s1749_s27 = sphi %s1809_s27, %s2109_s27   ;;  %s1745_s26 = sphi %s1807_s26, %s2108_s26   ;;  %s1741_s25 = sphi %s1805_s25, %s2107_s25   ;;  %s1737_s24 = sphi %s1803_s24, %s2106_s24  }
   0x8   : > { %p45_p0 = scmp.ne.s32.totalorder %s1741_s25, %s1737_s24  ;;  %p2084_p1 = scmp.eq.s32.totalorder %s1824_s28, 0 }
   0x9   : > { %p201_p3 = scmp.eq.s32.totalorder %s1220_s29, 1  ;;  %p1221_p5 = scmp.ge.s32.totalorder %s1749_s27, 1 }
   0xa   : > { %p1833_p4 = por %p2084_p1, %p45_p0  ;;  %p208_p7 = scmp.lt.s32.totalorder %s1749_s27, 3 }
   0xb   : > { %p1838_p6 = por %p201_p3, %p45_p0  ;;  %s1751_s10 = smov [#allocation5]  }
   0xc   : > { %s2088_s30 = scalar_select %p1833_p4, 1, 0 }
   0xd   : > { %s2089_s8 = scalar_select %p1838_p6, 1, 0 }
   0xe   : > { %p1843_p8 = pnand %p1221_p5, %p208_p7  ;;  %s220_s11 = sshll.u32 %s1751_s10, 4  ;;  %s1847_s11 = int_to_ptr.vmem [resolvable:$true] %s220_s11 }
   0xf   : > { %2090 = sst [smem:[#allocation15_spill]] %s2089_s8  ;;  %s1752_s13 = smov [#allocation7]  }
  0x10   : > { %s2091_s9 = scalar_select %p1843_p8, 1, 0 }
  0x11   : > { %p1405_p9 = pneg %p1843_p8  ;;  %s236_s14 = sshll.u32 %s1752_s13, 4  ;;  %s1858_s14 = int_to_ptr.vmem [resolvable:$true] %s236_s14 }
  0x12   : > { %s1753_s15 = smov [#allocation8]   ;;  %s1561_s19 = scalar_lea.hbm %s2077_s1, 4096 }
  0x13   : > { %p1854_p11 = pnand %p1405_p9, %p2084_p1  ;;  %s1860_s16 = sshll.u32 %s1753_s15, 4  ;;  %s253_s16 = int_to_ptr.vmem [resolvable:$true] %s1860_s16 }
  0x14   : > { %p1562_p12 = scmp.ne.s32.totalorder %s2077_s1, %s1561_s19  ;;  %p1568_p5 = scmp.lt.u32.totalorder %s1561_s19, %s2077_s1 }
  0x15   : > { %p1870_p13 = pneg %p1854_p11 }
  0x17   : > { %p1564_p0 = pnand %p1870_p13, %p1562_p12 }
  0x19   : > { %p1565_p3 = pneg %p1564_p0 }
  0x1b   : > { %p1570_p7 = pnand %p1568_p5, %p1565_p3 }
  0x1d   : > { %1573 = shalt.err (!%p1570_p7)
}
  0x1e   : > { %s1574_s10 = scalar_lea.vmem %s1847_s11, 4096  ;;  %p1582_p2 = scmp.lt.s32.totalorder %s1847_s11, %s1847_s11 }
  0x1f   : > { %p1575_p9 = scmp.ne.s32.totalorder %s1847_s11, %s1574_s10  ;;  %p1583_p6 = scmp.lt.s32.totalorder %s1574_s10, %s1574_s10 }
  0x21   : > { %p1577_p10 = pnand %p1575_p9, %p1870_p13  ;;  %p1584_p12 = por %p1583_p6, %p1582_p2 }
  0x23   : > { %p1578_p1 = pneg %p1577_p10 }
  0x25   : > { %p1585_p0 = pnand %p1584_p12, %p1578_p1 }
  0x27   : > { %1588 = shalt.err (!%p1585_p0)
}
  0x28   : > { %s1754_s13 = smov 64   ;;  %s1755_s15 = smov 4  }
  0x29   : > { %1408 = dma.hbm_to_vmem [thread:$0]  (!%p1854_p11), %s2077_s1, 4096, %s1847_s11, [#allocation6], %s1754_s13, %s1754_s13, %s1755_s15  }
  0x2a   : > { %s1589_s21 = scalar_lea.hbm %s2079_s3, 1024 }
  0x2b   : > { %p1590_p2 = scmp.ne.s32.totalorder %s2079_s3, %s1589_s21  ;;  %p1596_p10 = scmp.lt.u32.totalorder %s1589_s21, %s2079_s3 }
  0x2d   : > { %p1592_p1 = pnand %p1590_p2, %p1870_p13 }
  0x2f   : > { %p1593_p6 = pneg %p1592_p1 }
  0x31   : > { %p1598_p3 = pnand %p1596_p10, %p1593_p6 }
  0x33   : > { %1601 = shalt.err (!%p1598_p3)
}
  0x34   : > { %s1602_s11 = scalar_lea.vmem %s1858_s14, 1024  ;;  %p1610_p12 = scmp.lt.s32.totalorder %s1858_s14, %s1858_s14 }
  0x35   : > { %p1603_p5 = scmp.ne.s32.totalorder %s1858_s14, %s1602_s11  ;;  %p1611_p0 = scmp.lt.s32.totalorder %s1602_s11, %s1602_s11 }
  0x37   : > { %p1605_p7 = pnand %p1603_p5, %p1870_p13  ;;  %p1612_p2 = por %p1611_p0, %p1610_p12 }
  0x39   : > { %p1606_p9 = pneg %p1605_p7 }
  0x3b   : > { %p1613_p1 = pnand %p1612_p2, %p1606_p9 }
  0x3d   : > { %1616 = shalt.err (!%p1613_p1)
}
  0x3e   : > { %1411 = dma.hbm_to_vmem [thread:$0]  (!%p1854_p11), %s2079_s3, 1024, %s1858_s14, [#allocation6], %s1754_s13, %s1754_s13, %s1755_s15  }
  0x3f   : > { %s1617_s20 = scalar_lea.hbm %s2081_s5, 4096 }
  0x40   : > { %p1618_p6 = scmp.ne.s32.totalorder %s2081_s5, %s1617_s20  ;;  %p1624_p5 = scmp.lt.u32.totalorder %s1617_s20, %s2081_s5 }
  0x42   : > { %p1620_p10 = pnand %p1618_p6, %p1870_p13 }
  0x44   : > { %p1621_p3 = pneg %p1620_p10 }
  0x46   : > { %p1626_p7 = pnand %p1624_p5, %p1621_p3 }
  0x48   : > { %1629 = shalt.err (!%p1626_p7)
}
  0x49   : > { %s1630_s11 = scalar_lea.vmem %s253_s16, 4096  ;;  %p1638_p2 = scmp.lt.s32.totalorder %s253_s16, %s253_s16 }
  0x4a   : > { %p1631_p9 = scmp.ne.s32.totalorder %s253_s16, %s1630_s11  ;;  %p1639_p1 = scmp.lt.s32.totalorder %s1630_s11, %s1630_s11 }
  0x4c   : > { %p1633_p12 = pnand %p1631_p9, %p1870_p13  ;;  %p1640_p4 = por %p1639_p1, %p1638_p2 }
  0x4e   : > { %p1634_p0 = pneg %p1633_p12 }
  0x50   : > { %p1641_p8 = pnand %p1640_p4, %p1634_p0 }
  0x52   : > { %1644 = shalt.err (!%p1641_p8)
}
  0x53   : > { %s1756_s14 = smov 256   ;;  %s1757_s22 = smov 16  }
  0x54   : > { %1414 = dma.hbm_to_vmem [thread:$0]  (!%p1854_p11), %s2081_s5, 4096, %s253_s16, [#allocation9], %s1756_s14, %s1756_s14, %s1757_s22  }
  0x55   : > { %s1934_s8 = sadd.s32 1, %s1749_s27   ;;  %s32_s18 = sadd.s32 1, %s1745_s26 }
  0x56   : > { %s29_s17 = ssub.s32 %s1749_s27, %s1934_s8  ;;  %p39_p8 = scmp.ne.s32.totalorder %s1745_s26, %s1741_s25 }
  0x57   : > { %p30_p4 = scmp.eq.s32.totalorder %s29_s17, 0  ;;  %p40_p13 = scmp.eq.s32.totalorder %s1749_s27, 0 }
  0x58   : > { %p1426_p6 = scmp.lt.s32.totalorder %s1749_s27, 2  ;;  %p2094_p3 = scmp.eq.s32.totalorder %s1824_s28, 1 }
  0x59   : > { %s1944_s19 = scalar_select %p30_p4, %s1745_s26, %s32_s18  }
  0x5a   : > { %p41_p10 = por %p40_p13, %p39_p8  ;;  %p1948_p5 = por %p2094_p3, %p39_p8 }
  0x5b   : > { %s269_s12 = sand.u32 1, %s1745_s26   ;;  %s1314_s21 = sshll.u32 %s1749_s27, 9 }
  0x5c   : > { %s1226_s16 = sshll.u32 %s269_s12, 5  ;;  %s1957_s10 = scalar_lea.hbm %s2076_s0, %s1314_s21 }
  0x5d   : > { %s273_s11 = scalar_lea.vmem [#allocation2], %s1226_s16  ;;  %p1959_p11 = pnand %p1426_p6, %p41_p10 }
  0x5e   : > { %s281_s14 = sshll.u32 %s273_s11, 4  ;;  %s270_s13 = scalar_lea.sflag [#allocation3], %s269_s12  ;;  %s1963_s14 = int_to_ptr.vmem [resolvable:$true] %s281_s14 }
  0x5f   : > { %s1645_s15 = scalar_lea.hbm %s1957_s10, 512  ;;  %p1647_p9 = pneg %p1959_p11 }
  0x60   : > { %p1646_p7 = scmp.ne.s32.totalorder %s1957_s10, %s1645_s15  ;;  %s1650_s21 = scalar_lea.hbm %s2076_s0, 1024 }
  0x61   : > { %p1651_p2 = scmp.lt.u32.totalorder %s1957_s10, %s2076_s0  ;;  %p1652_p1 = scmp.lt.u32.totalorder %s1650_s21, %s1645_s15 }
  0x62   : > { %p1648_p12 = pnand %p1647_p9, %p1646_p7  ;;  %p1654_p8 = scmp.lt.u32.totalorder %s1645_s15, %s1957_s10 }
  0x63   : > { %p1653_p4 = por %p1652_p1, %p1651_p2 }
  0x64   : > { %p1649_p0 = pneg %p1648_p12 }
  0x65   : > { %p1655_p13 = por %p1654_p8, %p1653_p4 }
  0x67   : > { %p1656_p6 = pnand %p1655_p13, %p1649_p0 }
  0x69   : > { %1659 = shalt.err (!%p1656_p6)
}
  0x6a   : > { %s1660_s12 = scalar_lea.vmem %s1963_s14, 512  ;;  %s1758_s29 = smov [#allocation2]  }
  0x6b   : > { %p1661_p10 = scmp.ne.s32.totalorder %s1963_s14, %s1660_s12  ;;  %s1665_s11 = sshll.u32 %s1758_s29, 4  ;;  %s1666_s11 = int_to_ptr.vmem [resolvable:$false] %s1665_s11 }
  0x6c   : > { %s1667_s17 = scalar_lea.vmem %s1666_s11, 1024  ;;  %p1668_p12 = scmp.lt.s32.totalorder %s1963_s14, %s1666_s11 }
  0x6d   : > { %p1663_p3 = pnand %p1661_p10, %p1647_p9  ;;  %p1669_p2 = scmp.lt.s32.totalorder %s1667_s17, %s1660_s12 }
  0x6f   : > { %p1664_p7 = pneg %p1663_p3  ;;  %p1670_p1 = por %p1669_p2, %p1668_p12 }
  0x71   : > { %p1671_p4 = pnand %p1670_p1, %p1664_p7 }
  0x73   : > { %1674 = shalt.err (!%p1671_p4)
}
  0x74   : > { %1418 = dma.hbm_to_vmem [thread:$0]  (!%p1959_p11), %s1957_s10, 512, %s1963_s14, %s270_s13  }
  0x75   : > { %p2097_p0 = scmp.ne.s32.totalorder %s2091_s9, 0 }
  0x76   : > { %s1993_s15 = sand.u32 (!%p2097_p0), 1, %s1741_s25   ;;  %p2098_p9 = scmp.ne.s32.totalorder (!%p2097_p0), %s2088_s30, 0 }
  0x77   : > { %290 = sbr.rel (%p2097_p0) target bundleno = 838 (0x346), region = 48  ;;  %s1230_s18 = sshll.u32 (!%p2097_p0), %s1993_s15, 5 }
  0x78   : > { %s293_s21 = scalar_lea.sflag (!%p2097_p0), [#allocation3], %s1993_s15  ;;  %s1999_s16 = scalar_lea.vmem (!%p2097_p0), [#allocation2], %s1230_s18 }
  0x7e   : > { %1720 = dma.done.wait (%p2098_p9), %s293_s21, 512  }
  0x7f   : > { %1722 = vsyncadd (%p2098_p9), %s293_s21, 4294966784  ;;  %p2099_p11 = scmp.eq.s32.totalorder %s1824_s28, 0 }
  0x81   : > { %1724 = dma.done.wait (%p2099_p11), [#allocation6], 5120   ;;  %p2100_p8 = pmov %p2099_p11 }
  0x83   : > { %1726 = vsyncadd (%p2100_p8), [#allocation6], 4294962176  ;;  %p2101_p13 = pmov %p2100_p8 }
  0x84   : > { %p2102_p6 = pmov %p2100_p8 }
  0x85   : > { %1728 = dma.done.wait (%p2101_p13), [#allocation9], 4096  }
  0x86   : > { %1730 = vsyncadd (%p2102_p6), [#allocation9], 4294963200  ;;  %v1473_v0 = vld [vmem:[#allocation5 + $0x40] sm:$0xff]   ;;  %v1477_v4 = vld [vmem:[#allocation5 + $0x48] sm:$0xff]   ;;  %v1759_v39 = vmov 0.0   ;;  %vm1760_vm0 = vmmov 0  }
  0x87   : > { %v1474_v1 = vld [vmem:[#allocation5 + $0xc0] sm:$0xff]   ;;  %1316 = vmatprep.subr.bf16.mxu0 %v1473_v0  ;;  %v1478_v5 = vld [vmem:[#allocation5 + $0xc8] sm:$0xff]   ;;  %v1481_v8 = vld [vmem:[#allocation5 + $0x50] sm:$0xff]   ;;  %s1315_s23 = sshll.u32 %s1824_s28, 9  ;;  %s338_s12 = scalar_lea.vmem [#allocation10], %s1230_s18 }
  0x88   : > { %v1475_v2 = vld [vmem:[#allocation5] sm:$0xff]   ;;  %1338 = vmatprep.subr.bf16.mxu1 %v1474_v1  ;;  %v1479_v6 = vld [vmem:[#allocation5 + $0x8] sm:$0xff]   ;;  %v1482_v9 = vld [vmem:[#allocation5 + $0xd0] sm:$0xff]   ;;  %s1121_s29 = sshll.u32 %s338_s12, 4  ;;  %s2032_s21 = scalar_lea.hbm %s2083_s7, %s1315_s23  ;;  %s2034_s29 = int_to_ptr.vmem [resolvable:$true] %s1121_s29 }
  0x89   : > { %v1476_v3 = vld [vmem:[#allocation5 + $0x80] sm:$0xff]   ;;  %1317 = vmatpush3.bf16.msra.mxu0 %v1475_v2  ;;  %v1480_v7 = vld [vmem:[#allocation5 + $0x88] sm:$0xff]   ;;  %v1483_v10 = vld [vmem:[#allocation5 + $0x10] sm:$0xff]   ;;  %s1107_s28 = scalar_lea.sflag [#allocation4], %s1993_s15  ;;  %s1675_s18 = scalar_lea.vmem %s2034_s29, 512 }
  0x8a   : > { %1339 = vmatpush3.bf16.msra.mxu1 %v1476_v3  ;;  %1318 = vmatprep.subr.bf16.mxu0 %v1477_v4  ;;  %v1484_v11 = vld [vmem:[#allocation5 + $0x90] sm:$0xff]   ;;  %v1485_v12 = vld [vmem:[#allocation5 + $0x58] sm:$0xff]   ;;  %v1489_v16 = vld [vmem:[#allocation5 + $0x60] sm:$0xff]   ;;  %p1676_p10 = scmp.ne.s32.totalorder %s2034_s29, %s1675_s18 }
  0x8b   : > { %1340 = vmatprep.subr.bf16.mxu1 %v1478_v5  ;;  %v1486_v13 = vld [vmem:[#allocation5 + $0xd8] sm:$0xff]   ;;  %v1490_v17 = vld [vmem:[#allocation5 + $0xe0] sm:$0xff]   ;;  %v1493_v20 = vld [vmem:[#allocation5 + $0x68] sm:$0xff]  }
  0x8c   : > { %v1487_v14 = vld [vmem:[#allocation5 + $0x18] sm:$0xff]   ;;  %v1491_v18 = vld [vmem:[#allocation5 + $0x20] sm:$0xff]   ;;  %v1494_v21 = vld [vmem:[#allocation5 + $0xe8] sm:$0xff]   ;;  %p1677_p3 = pnand %p1676_p10, %p1948_p5 }
  0x8d   : > { %1319 = vmatpush3.bf16.msra.mxu0 %v1479_v6  ;;  %v1488_v15 = vld [vmem:[#allocation5 + $0x98] sm:$0xff]   ;;  %v1492_v19 = vld [vmem:[#allocation5 + $0xa0] sm:$0xff]   ;;  %v1495_v22 = vld [vmem:[#allocation5 + $0x28] sm:$0xff]  }
  0x8e   : > { %1341 = vmatpush3.bf16.msra.mxu1 %v1480_v7  ;;  %1320 = vmatprep.subr.bf16.mxu0 %v1481_v8  ;;  %v1496_v23 = vld [vmem:[#allocation5 + $0xa8] sm:$0xff]   ;;  %v1497_v24 = vld [vmem:[#allocation5 + $0x70] sm:$0xff]   ;;  %v1501_v28 = vld [vmem:[#allocation5 + $0x78] sm:$0xff]   ;;  %p1678_p7 = pneg %p1677_p3 }
  0x8f   : > { %1342 = vmatprep.subr.bf16.mxu1 %v1482_v9  ;;  %v1498_v25 = vld [vmem:[#allocation5 + $0xf0] sm:$0xff]   ;;  %v1502_v29 = vld [vmem:[#allocation5 + $0xf8] sm:$0xff]   ;;  %v341_v32 = vld [vmem:[%s1999_s16 + $0x8] sm:$0xff] }
  0x90   : > { %v1499_v26 = vld [vmem:[#allocation5 + $0x30] sm:$0xff]   ;;  %v1503_v30 = vld [vmem:[#allocation5 + $0x38] sm:$0xff]   ;;  %v340_v34 = vld [vmem:[%s1999_s16] sm:$0xff]  ;;  %v345_v35 = vpack.c.bf16 %v341_v32, %v341_v32  ;;  %v1761_v32 = vmov 0  }
  0x91   : > { %1321 = vmatpush3.bf16.msra.mxu0 %v1483_v10  ;;  %v1500_v27 = vld [vmem:[#allocation5 + $0xb0] sm:$0xff]   ;;  %v1504_v31 = vld [vmem:[#allocation5 + $0xb8] sm:$0xff]   ;;  %v344_v37 = vpack.c.bf16 %v340_v34, %v340_v34  ;;  %v1505_v41 = vld [vmem:[#allocation7] sm:$0xff]  }
  0x92   : > { %1343 = vmatpush3.bf16.msra.mxu1 %v1484_v11  ;;  %1322 = vmatprep.subr.bf16.mxu0 %v1485_v12  ;;  %v343_v33 = vld [vmem:[%s1999_s16 + $0x18] sm:$0xff]  ;;  %v342_v38 = vld [vmem:[%s1999_s16 + $0x10] sm:$0xff]  ;;  %v1506_v42 = vld [vmem:[#allocation7 + $0x8] sm:$0xff]   ;;  %s1762_s16 = smov [#allocation10]  }
  0x93   : > { %1344 = vmatprep.subr.bf16.mxu1 %v1486_v13  ;;  %v347_v36 = vpack.c.bf16 %v343_v33, %v343_v33  ;;  %v346_v40 = vpack.c.bf16 %v342_v38, %v342_v38  ;;  %643 = vmatprep.mubr.bf16.mxu0 %v345_v35  ;;  %v1507_v43 = vld [vmem:[#allocation7 + $0x10] sm:$0xff]   ;;  %v1508_v44 = vld [vmem:[#allocation7 + $0x18] sm:$0xff]   ;;  %v1509_v45 = vld [vmem:[#allocation7 + $0x20] sm:$0xff]   ;;  %s1679_s30 = sshll.u32 %s1762_s16, 4  ;;  %s1680_s30 = int_to_ptr.vmem [resolvable:$false] %s1679_s30 }
  0x94   : > { %v1510_v46 = vld [vmem:[#allocation7 + $0x28] sm:$0xff]   ;;  %v1511_v47 = vld [vmem:[#allocation7 + $0x30] sm:$0xff]   ;;  %v1512_v48 = vld [vmem:[#allocation7 + $0x38] sm:$0xff]   ;;  %s1681_s9 = scalar_lea.vmem %s1680_s30, 1024  ;;  %p1682_p12 = scmp.lt.s32.totalorder %s2034_s29, %s1680_s30 }
  0x95   : > { %1323 = vmatpush3.bf16.msra.mxu0 %v1487_v14  ;;  %683 = vmatprep.mubr.bf16.mxu1 %v347_v36  ;;  %v1513_v49 = vld [vmem:[#allocation8] ss:$16 sps:$4 sm:$0xff]   ;;  %v1515_v50 = vld [vmem:[#allocation8 + $0x4] ss:$16 sps:$4 sm:$0xff]   ;;  %v1518_v51 = vld [vmem:[#allocation8 + $0xc] ss:$16 sps:$4 sm:$0xff]   ;;  %p1683_p2 = scmp.lt.s32.totalorder %s1681_s9, %s1675_s18 }
  0x96   : > { %1345 = vmatpush3.bf16.msra.mxu1 %v1488_v15  ;;  %1324 = vmatprep.subr.bf16.mxu0 %v1489_v16  ;;  %v1521_v52 = vld [vmem:[#allocation8 + $0x24] ss:$16 sps:$4 sm:$0xff]   ;;  %v1519_v53 = vld [vmem:[#allocation8 + $0x20] ss:$16 sps:$4 sm:$0xff]   ;;  %v1516_v14 = vld [vmem:[#allocation8 + $0x8] ss:$16 sps:$4 sm:$0xff]  }
  0x97   : > { %1346 = vmatprep.subr.bf16.mxu1 %v1490_v17  ;;  %v1527_v54 = vld [vmem:[#allocation8 + $0x44] ss:$16 sps:$4 sm:$0xff]   ;;  %v1525_v55 = vld [vmem:[#allocation8 + $0x40] ss:$16 sps:$4 sm:$0xff]   ;;  %v1524_v16 = vld [vmem:[#allocation8 + $0x2c] ss:$16 sps:$4 sm:$0xff]   ;;  %p1684_p1 = por %p1683_p2, %p1682_p12 }
  0x98   : > { %v1533_v56 = vld [vmem:[#allocation8 + $0x64] ss:$16 sps:$4 sm:$0xff]   ;;  %v1531_v57 = vld [vmem:[#allocation8 + $0x60] ss:$16 sps:$4 sm:$0xff]   ;;  %v1522_v17 = vld [vmem:[#allocation8 + $0x28] ss:$16 sps:$4 sm:$0xff]  }
  0x99   : > { %1325 = vmatpush3.bf16.msra.mxu0 %v1491_v18  ;;  %v1539_v58 = vld [vmem:[#allocation8 + $0x84] ss:$16 sps:$4 sm:$0xff]   ;;  %v1537_v59 = vld [vmem:[#allocation8 + $0x80] ss:$16 sps:$4 sm:$0xff]   ;;  %v1530_v18 = vld [vmem:[#allocation8 + $0x4c] ss:$16 sps:$4 sm:$0xff]   ;;  %p1685_p4 = pnand %p1684_p1, %p1678_p7 }
  0x9a   : > { %1347 = vmatpush3.bf16.msra.mxu1 %v1492_v19  ;;  %1326 = vmatprep.subr.bf16.mxu0 %v1493_v20  ;;  %v1545_v60 = vld [vmem:[#allocation8 + $0xa4] ss:$16 sps:$4 sm:$0xff]   ;;  %v1543_v61 = vld [vmem:[#allocation8 + $0xa0] ss:$16 sps:$4 sm:$0xff]   ;;  %v1528_v19 = vld [vmem:[#allocation8 + $0x48] ss:$16 sps:$4 sm:$0xff]  }
  0x9b   : > { %1348 = vmatprep.subr.bf16.mxu1 %v1494_v21  ;;  %v1551_v62 = vld [vmem:[#allocation8 + $0xc4] ss:$16 sps:$4 sm:$0xff]   ;;  %v1549_v63 = vld [vmem:[#allocation8 + $0xc0] ss:$16 sps:$4 sm:$0xff]   ;;  %v1536_v20 = vld [vmem:[#allocation8 + $0x6c] ss:$16 sps:$4 sm:$0xff]  }
  0x9c   : > { %v1235_v2 = vld [vmem:[%s2078_s2] ss:$0 sm:$0xff]  ;;  %v1534_v21 = vld [vmem:[#allocation8 + $0x68] ss:$16 sps:$4 sm:$0xff]  }
  0x9d   : > { %1327 = vmatpush3.bf16.msra.mxu0 %v1495_v22  ;;  %v1542_v22 = vld [vmem:[#allocation8 + $0x8c] ss:$16 sps:$4 sm:$0xff]   ;;  %v1268_v33 = vld [vmem:[%s2080_s4] ss:$0 sm:$0xff] }
  0x9e   : > { %1349 = vmatpush3.bf16.msra.mxu1 %v1496_v23  ;;  %1328 = vmatprep.subr.bf16.mxu0 %v1497_v24  ;;  %v1540_v23 = vld [vmem:[#allocation8 + $0x88] ss:$16 sps:$4 sm:$0xff]   ;;  %v1548_v24 = vld [vmem:[#allocation8 + $0xac] ss:$16 sps:$4 sm:$0xff]  }
  0x9f   : > { %1350 = vmatprep.subr.bf16.mxu1 %v1498_v25  ;;  %v1546_v25 = vld [vmem:[#allocation8 + $0xa8] ss:$16 sps:$4 sm:$0xff]  }
  0xa1   : > { %1329 = vmatpush3.bf16.msra.mxu0 %v1499_v26  ;;  %v1554_v26 = vld [vmem:[#allocation8 + $0xcc] ss:$16 sps:$4 sm:$0xff]  }
  0xa2   : > { %1351 = vmatpush3.bf16.msra.mxu1 %v1500_v27  ;;  %1330 = vmatprep.subr.bf16.mxu0 %v1501_v28  ;;  %v1552_v27 = vld [vmem:[#allocation8 + $0xc8] ss:$16 sps:$4 sm:$0xff]   ;;  %v1557_v28 = vld [vmem:[#allocation8 + $0xe4] ss:$16 sps:$4 sm:$0xff]  }
  0xa3   : > { %1352 = vmatprep.subr.bf16.mxu1 %v1502_v29  ;;  %v1560_v29 = vld [vmem:[#allocation8 + $0xec] ss:$16 sps:$4 sm:$0xff]  }
  0xa5   : > { %1331 = vmatpush3.bf16.msra.mxu0 %v1503_v30  ;;  %v1555_v30 = vld [vmem:[#allocation8 + $0xe0] ss:$16 sps:$4 sm:$0xff]  }
  0xa6   : > { %1353 = vmatpush3.bf16.msra.mxu1 %v1504_v31  ;;  %1369 = vmatprep.subr.bf16.mxu0 %v1759_v39  ;;  %v1558_v31 = vld [vmem:[#allocation8 + $0xe8] ss:$16 sps:$4 sm:$0xff]  }
  0xa7   : > { %1020 = vmatprep.subr.bf16.mxu1 %v1515_v50 }
  0xa8   : > { %644 = vmatmul.mubr.bf16.vlgmr.msra.gmra.mrb[0].mxu0 %v344_v37 }
  0xa9   : > { %684 = vmatmul.mubr.bf16.vlgmr.msra.gmra.mrb[0].mxu1 %v346_v40  ;;  %1370 = vmatpush3.bf16.msra.mxu0 %v1505_v41  ;;  %v840_v41 = vlaneseq }
  0xaa   : > { %1371 = vmatprep.subr.bf16.mxu0 %v1759_v39  ;;  %1385 = vmatprep.mubr.msk.bf16.mxu0 %vm1760_vm0, %v1759_v39 }
  0xab   : > { %1021 = vmatpush1.bf16.msra.mxu1 %v1513_v49  ;;  %1052 = vmatprep.mubr.bf16.mxu1 %v1761_v32 }
  0xac   : > { %1022 = vmatprep.subr.bf16.mxu1 %v1521_v52 }
  0xad   : > { %1372 = vmatpush3.bf16.msra.mxu0 %v1506_v42  ;;  %v841_v42 = vshrl.u32 %v840_v41, 7 }
  0xae   : > { %1373 = vmatprep.subr.bf16.mxu0 %v1759_v39 }
  0xaf   : > { %1023 = vmatpush1.bf16.msra.mxu1 %v1519_v53 }
  0xb0   : > { %1024 = vmatprep.subr.bf16.mxu1 %v1527_v54 }
  0xb1   : > { %1374 = vmatpush3.bf16.msra.mxu0 %v1507_v43  ;;  %v842_v43 = vsub.s32 0, %v841_v42 }
  0xb2   : > { %1375 = vmatprep.subr.bf16.mxu0 %v1759_v39 }
  0xb3   : > { %1025 = vmatpush1.bf16.msra.mxu1 %v1525_v55 }
  0xb4   : > { %1026 = vmatprep.subr.bf16.mxu1 %v1533_v56 }
  0xb5   : > { %1376 = vmatpush3.bf16.msra.mxu0 %v1508_v44  ;;  %v850_v44 = vsub.s32 2, %v841_v42 }
  0xb6   : > { %1377 = vmatprep.subr.bf16.mxu0 %v1759_v39 }
  0xb7   : > { %1027 = vmatpush1.bf16.msra.mxu1 %v1531_v57 }
  0xb8   : > { %1028 = vmatprep.subr.bf16.mxu1 %v1539_v58 }
  0xb9   : > { %1378 = vmatpush3.bf16.msra.mxu0 %v1509_v45  ;;  %v838_v45 = vld [vmem:[%s2082_s6] sm:$0xf] }
  0xba   : > { %1379 = vmatprep.subr.bf16.mxu0 %v1759_v39  ;;  %v851_v49 = vrot.slane %v838_v45, %v850_v44 }
  0xbb   : > { %1029 = vmatpush1.bf16.msra.mxu1 %v1537_v59 }
  0xbc   : > { %1030 = vmatprep.subr.bf16.mxu1 %v1545_v60 }
  0xbd   : > { %1380 = vmatpush3.bf16.msra.mxu0 %v1510_v46  ;;  %v846_v46 = vsub.s32 1, %v841_v42 }
  0xbe   : > { %1381 = vmatprep.subr.bf16.mxu0 %v1759_v39 }
  0xbf   : > { %1031 = vmatpush1.bf16.msra.mxu1 %v1543_v61  ;;  %v847_v50 = vrot.slane %v838_v45, %v846_v46 }
  0xc0   : > { %1032 = vmatprep.subr.bf16.mxu1 %v1551_v62 }
  0xc1   : > { %1382 = vmatpush3.bf16.msra.mxu0 %v1511_v47  ;;  %v854_v47 = vsub.s32 3, %v841_v42 }
  0xc2   : > { %1383 = vmatprep.subr.bf16.mxu0 %v1759_v39 }
  0xc3   : > { %1033 = vmatpush1.bf16.msra.mxu1 %v1549_v63 }
  0xc4   : > { %1034 = vmatprep.subr.bf16.mxu1 %v1557_v28 }
  0xc5   : > { %1384 = vmatpush3.bf16.msra.mxu0 %v1512_v48  ;;  %v843_v48 = vrot.slane %v838_v45, %v842_v43 }
  0xc6   : > { %1061 = vmatprep.subr.bf16.mxu0 %v1518_v51  ;;  %v855_v51 = vrot.slane %v838_v45, %v854_v47 }
  0xc7   : > { %1035 = vmatpush1.bf16.msra.mxu1 %v1555_v30 }
 0x17b   : > { %v1332_v0 = vpop.f32.mrb[0].mxu0 }
 0x17c   : > { %v1354_v1 = vpop.f32.mrb[0].mxu1  ;;  %v1333_v3 = vpop.f32.mrb[1].mxu0 }
 0x17d   : > { %v1355_v4 = vpop.f32.mrb[1].mxu1  ;;  %v1334_v5 = vadd.f32 %v1333_v3, %v1332_v0  ;;  %v1335_v7 = vpop.f32.mrb[2].mxu0 }
 0x17e   : > { %v1356_v6 = vadd.f32 %v1355_v4, %v1354_v1  ;;  %v1357_v8 = vpop.f32.mrb[2].mxu1  ;;  %v1336_v9 = vpop.f32.mrb[3].mxu0 }
 0x17f   : > { %v1358_v10 = vpop.f32.mrb[3].mxu1  ;;  %v646_v11 = vadd.f32 %v1334_v5, %v1235_v2 }
 0x181   : > { %v686_v12 = vadd.f32 %v1356_v6, %v646_v11 }
 0x183   : > { %v691_v13 = vmax.f32 %v686_v12, 0.0 }
 0x185   : > { %v692_v15 = vpack.c.bf16 %v691_v13, %v691_v13 }
 0x187   : > { %1386 = vmatmul.mubr.bf16.vlgmr.msra.gmra.mrb[4].mxu0 %v692_v15 }
 0x188   : > { %1062 = vmatpush1.bf16.msra.mxu0 %v1516_v14  ;;  %1093 = vmatprep.mubr.bf16.mxu0 %v1761_v32 }
 0x189   : > { %1063 = vmatprep.subr.bf16.mxu0 %v1524_v16 }
 0x18c   : > { %1064 = vmatpush1.bf16.msra.mxu0 %v1522_v17 }
 0x18d   : > { %1065 = vmatprep.subr.bf16.mxu0 %v1530_v18 }
 0x190   : > { %1066 = vmatpush1.bf16.msra.mxu0 %v1528_v19 }
 0x191   : > { %1067 = vmatprep.subr.bf16.mxu0 %v1536_v20 }
 0x194   : > { %1068 = vmatpush1.bf16.msra.mxu0 %v1534_v21 }
 0x195   : > { %1069 = vmatprep.subr.bf16.mxu0 %v1542_v22 }
 0x198   : > { %1070 = vmatpush1.bf16.msra.mxu0 %v1540_v23 }
 0x199   : > { %1071 = vmatprep.subr.bf16.mxu0 %v1548_v24 }
 0x19c   : > { %1072 = vmatpush1.bf16.msra.mxu0 %v1546_v25 }
 0x19d   : > { %1073 = vmatprep.subr.bf16.mxu0 %v1554_v26 }
 0x1a0   : > { %1074 = vmatpush1.bf16.msra.mxu0 %v1552_v27 }
 0x1a1   : > { %1075 = vmatprep.subr.bf16.mxu0 %v1560_v29 }
 0x1a4   : > { %1076 = vmatpush1.bf16.msra.mxu0 %v1558_v31 }
 0x25a   : > { %v798_v34 = vpop.f32.mrb[4].mxu0 }
 0x25b   : > { %v799_v35 = vadd.f32 %v1268_v33, %v798_v34  ;;  %v1387_v36 = vpop.f32.mrb[5].mxu0 }
 0x25c   : > { %v801_v37 = vpop.f32.mrb[6].mxu0 }
 0x25d   : > { %v804_v38 = vmax.f32 %v799_v35, 0.0  ;;  %v1388_v39 = vpop.f32.mrb[7].mxu0 }
 0x25f   : > { %v805_v40 = vpack.c.bf16 %v804_v38, %v804_v38 }
 0x261   : > { %1053 = vmatmul.mubr.bf16.vlgmr.msra.gmra.mrb[4].mxu1 %v805_v40  ;;  %1094 = vmatmul.mubr.bf16.vlgmr.msra.gmra.mrb[8].mxu0 %v805_v40 }
 0x334   : > { %v1054_v52 = vpop.f32.mrb[4].mxu1  ;;  %v1095_v53 = vpop.f32.mrb[8].mxu0 }
 0x335   : > { %v1055_v54 = vadd.f32 %v1054_v52, %v843_v48  ;;  %v1096_v55 = vadd.f32 %v1095_v53, %v851_v49  ;;  %v1056_v56 = vpop.f32.mrb[5].mxu1  ;;  %v1097_v57 = vpop.f32.mrb[9].mxu0 }
 0x336   : > { %v1057_v58 = vadd.f32 %v1056_v56, %v847_v50  ;;  %v1098_v59 = vadd.f32 %v1097_v57, %v855_v51  ;;  %v1058_v60 = vpop.f32.mrb[6].mxu1  ;;  %v1099_v61 = vpop.f32.mrb[10].mxu0 }
 0x337   : > { %1102 = vst [vmem:[%s338_s12] sm:$0xff] %v1055_v54  ;;  %1104 = vst [vmem:[%s338_s12 + $0x10] sm:$0xff] %v1096_v55  ;;  %v1059_v62 = vpop.f32.mrb[7].mxu1  ;;  %v1100_v63 = vpop.f32.mrb[11].mxu0 }
 0x338   : > { %1103 = vst [vmem:[%s338_s12 + $0x8] sm:$0xff] %v1057_v58  ;;  %1105 = vst [vmem:[%s338_s12 + $0x18] sm:$0xff] %v1098_v59 }
 0x339   : > { %1688 = shalt.err (!%p1685_p4)
}
 0x33a   : > { %s1689_s15 = scalar_lea.hbm %s2032_s21, 512  ;;  %s1693_s22 = scalar_lea.hbm %s2083_s7, 1024 }
 0x33b   : > { %p1690_p0 = scmp.ne.s32.totalorder %s2032_s21, %s1689_s15  ;;  %p1694_p8 = scmp.lt.u32.totalorder %s2032_s21, %s2083_s7 }
 0x33c   : > { %p1695_p13 = scmp.lt.u32.totalorder %s1693_s22, %s1689_s15  ;;  %p1697_p10 = scmp.lt.u32.totalorder %s1689_s15, %s2032_s21 }
 0x33d   : > { %p1691_p9 = pnand %p1690_p0, %p1948_p5 }
 0x33e   : > { %p1696_p6 = por %p1695_p13, %p1694_p8 }
 0x33f   : > { %p1692_p11 = pneg %p1691_p9 }
 0x340   : > { %p1698_p3 = por %p1697_p10, %p1696_p6 }
 0x342   : > { %p1699_p7 = pnand %p1698_p3, %p1692_p11 }
 0x344   : > { %1702 = shalt.err (!%p1699_p7)
}
 0x345   : > { %1403 = dma.vmem_to_hbm [thread:$0]  (%p1948_p5), %s2034_s29, 512, %s2032_s21, %s1107_s28  }
 0x346 PF: > { %s2103_s12 = sld [smem:[#allocation15_spill]]  ;;  %s1133_s11 = sand.u32 1, %s1737_s24  }
 0x347   : > { %p2105_p2 = scmp.ge.s32.totalorder %s1749_s27, 2  ;;  %s1134_s17 = scalar_lea.sflag [#allocation4], %s1133_s11 }
 0x34c   : > { %p2104_p12 = scmp.ne.s32.totalorder %s2103_s12, 0 }
 0x34e   : > { %p1420_p1 = pnand %p2105_p2, %p2104_p12 }
 0x350   : > { %1732 = dma.done.wait (!%p1420_p1), %s1134_s17, 512  }
 0x351   : > { %1734 = vsyncadd (!%p1420_p1), %s1134_s17, 4294966784  ;;  %p22_p4 = scmp.ge.s32.totalorder %s1934_s8, 4   ;;  %s2106_s24 = smov %s1741_s25 }
 0x352   : > { %s2107_s25 = smov %s1745_s26  ;;  %s2108_s26 = smov %s1944_s19 }
 0x353   : > { %s2109_s27 = smov %s1934_s8  ;;  %24 = sbr.rel (!%p22_p4) target bundleno = 7 (0x7), region = 105 }
 0x35a   :  { %1139 = vsyncpa [#allocation3], 1 }
 0x35b   :  { %1141 = vsyncpa [#allocation3 + $0x1], 1 }
 0x35c   :  { %1142 = vsyncpa [#allocation6], 1 }
 0x35d   :  { %1143 = vsyncpa [#allocation9], 1 }
 0x35e   :  { %1144 = vsyncpa [#allocation4], 1 }
 0x35f   :  { %1146 = vsyncpa [#allocation4 + $0x1], 1 }

</bundles_post_ra>
